<compile_context>
chip_gen: v6e
topology: v6e:2x2x1
jax: 0.10.0
libtpu: 0.0.40
codegen_flags: <defaults>
</compile_context>

<pallas_src>
import functools

import numpy as np

import jax
import jax.numpy as jnp
from jax.experimental import pallas as pl
from jax.experimental.pallas import tpu as pltpu


# --------------------------------------------------------------------------
# small helpers
# --------------------------------------------------------------------------
def _pair(v):
    if isinstance(v, (tuple, list)):
        assert len(v) == 2
        return int(v[0]), int(v[1])
    return int(v), int(v)


def _round_up(x, m):
    return ((x + m - 1) // m) * m


def _window_matrix_np(out_dim, in_dim, k, s, p):
    """0/1 matrix W[o, c] = 1 iff unpadded input index c falls inside output
    window o (padded range [o*s, o*s+k) -> unpadded [o*s-p, o*s-p+k), clipped
    to [0, in_dim); zero padding contributes nothing and the divisor stays k)."""
    o = np.arange(out_dim)[:, None]
    c = np.arange(in_dim)[None, :]
    start = o * s - p
    return ((c >= start) & (c < start + k)).astype(np.float32)


@functools.lru_cache(maxsize=64)
def _fused_operator(H, W, out_h, out_w, kh, kw, sh, sw, pad_h, pad_w,
                    ohw_pad, dtype_name):
    """Fused (Ph ⊗ Pw)^T pooling operator, columns zero-padded to ohw_pad."""
    Ph = _window_matrix_np(out_h, H, kh, sh, pad_h)          # (out_h, H)
    Pw = _window_matrix_np(out_w, W, kw, sw, pad_w)          # (out_w, W)
    M = np.kron(Ph, Pw).T                                    # (H*W, out_h*out_w)
    ohw = out_h * out_w
    if ohw_pad > ohw:
        M = np.pad(M, ((0, 0), (0, ohw_pad - ohw)))
    return jnp.asarray(M).astype(jnp.dtype(dtype_name))


@functools.lru_cache(maxsize=64)
def _separable_operators(H, W, out_h, out_w, kh, kw, sh, sw, pad_h, pad_w,
                         ow_pad, dtype_name):
    """Row operator Ph (out_h, H) and column operator Pw^T (W, ow_pad)."""
    Ph = _window_matrix_np(out_h, H, kh, sh, pad_h)          # (out_h, H)
    PwT = _window_matrix_np(out_w, W, kw, sw, pad_w).T       # (W, out_w)
    if ow_pad > out_w:
        PwT = np.pad(PwT, ((0, 0), (0, ow_pad - out_w)))
    dt = jnp.dtype(dtype_name)
    return jnp.asarray(Ph).astype(dt), jnp.asarray(PwT).astype(dt)


def _vmem_budget_bytes():
    """Generation-aware scoped-VMEM budget: ~5/8 of physical, capped at 96 MiB.
    ≈80 MiB on the 128-MiB parts (v5e/v6e), ≈40 MiB on v7x (64 MiB physical)."""
    phys = 64 * 1024 * 1024
    try:
        phys = int(pltpu.get_tpu_info().vmem_capacity_bytes)
    except Exception:
        pass
    return int(min(96 * 1024 * 1024, (phys * 5) // 8))


def _num_tensorcores():
    """2 for multi-TensorCore chips (v7x / megacore parts), else 1."""
    try:
        kind = jax.devices()[0].device_kind.lower()
    except Exception:
        return 1
    if ("v7" in kind) or ("7x" in kind) or ("v4" in kind) or ("v5p" in kind):
        return 2
    return 1


# --------------------------------------------------------------------------
# kernels
# --------------------------------------------------------------------------
def _fused_kernel(x_ref, m_ref, o_ref, *, scale):
    # x_ref: (B, H*W)            batch of flattened input planes
    # m_ref: (H*W, ohw_pad)      fused (Ph ⊗ Pw)^T operator (lane-padded)
    # o_ref: (B, ohw_pad)        batch of flattened output planes
    acc = jnp.dot(x_ref[...], m_ref[...], preferred_element_type=jnp.float32)
    o_ref[...] = (acc * scale).astype(o_ref.dtype)


def _separable_kernel(x_ref, pwt_ref, ph_ref, o_ref, *, scale, planes):
    # x_ref:  (planes, H, W)
    # pwt_ref:(W, ow_pad)    column pooling operator (lane-padded)
    # ph_ref: (out_h, H)     row pooling operator
    # o_ref:  (planes, out_h, ow_pad)
    pwt = pwt_ref[...]
    ph = ph_ref[...].astype(jnp.float32)
    for b in range(planes):  # static unroll; planes is small
        rows = jnp.dot(x_ref[b], pwt, preferred_element_type=jnp.float32)
        o_ref[b] = (jnp.dot(ph, rows, preferred_element_type=jnp.float32)
                    * scale).astype(o_ref.dtype)


# --------------------------------------------------------------------------
# wrapper
# --------------------------------------------------------------------------
def avg_pool2d(x, kernel_size, stride=None, padding=0):
    """Pallas AvgPool2d matching torch.nn.AvgPool2d defaults. x is NCHW."""
    kh, kw = _pair(kernel_size)
    sh, sw = _pair(kernel_size if stride is None else stride)
    pad_h, pad_w = _pair(padding)

    assert jnp.issubdtype(x.dtype, jnp.floating), "floating dtypes only"
    # nn.AvgPool2d enforces pad <= kernel_size / 2.
    assert pad_h <= kh // 2 and pad_w <= kw // 2, \
        "pad should be at most half of kernel size"

    N, C, H, W = x.shape
    out_h = (H + 2 * pad_h - kh) // sh + 1
    out_w = (W + 2 * pad_w - kw) // sw + 1
    assert out_h > 0 and out_w > 0

    NC, HW, OHW = N * C, H * W, out_h * out_w
    itemsize = jnp.dtype(x.dtype).itemsize
    dtype_name = jnp.dtype(x.dtype).name
    scale = 1.0 / float(kh * kw)       # count_include_pad=True

    vmem_budget = _vmem_budget_bytes()
    cores = _num_tensorcores()
    sub = 16 if itemsize <= 2 else 8   # sublane packing granularity

    ohw_pad = _round_up(OHW, 128)      # lane-dense output stores
    m_bytes = HW * ohw_pad * itemsize
    use_fused = (3 * m_bytes) <= vmem_budget   # threshold halves on v7x

    if use_fused:
        Mt = _fused_operator(H, W, out_h, out_w, kh, kw, sh, sw,
                             pad_h, pad_w, ohw_pad, dtype_name)
        xf = x.reshape(NC, HW)         # free reshape of contiguous NCHW

        # Plane batch per step: target ~8 MiB input blocks, bounded by the
        # VMEM budget (double-buffered in/out blocks + single-buffered Mt).
        per_plane = 2 * (HW + ohw_pad) * itemsize
        avail = (vmem_budget * 7) // 8 - m_bytes
        b_vmem = max(1, avail // per_plane)
        b_target = max(1, (8 * 1024 * 1024) // (HW * itemsize))
        B = min(b_vmem, b_target)
        B = max(sub, (B // sub) * sub)
        if B >= NC:
            B = NC
            # Split into >=2 steps only when both TensorCores exist AND each
            # half is still a sizeable block (>= 2 MiB of input).
            if (cores >= 2 and NC % (2 * sub) == 0
                    and (NC // 2) * HW * itemsize >= 2 * 1024 * 1024):
                B = NC // 2
        grid = (pl.cdiv(NC, B),)

        kernel = functools.partial(_fused_kernel, scale=scale)
        cost = pl.CostEstimate(
            flops=2 * NC * HW * ohw_pad,
            transcendentals=0,
            bytes_accessed=NC * (HW + ohw_pad) * itemsize + m_bytes,
        )
        out = pl.pallas_call(
            kernel,
            out_shape=jax.ShapeDtypeStruct((NC, ohw_pad), x.dtype),
            grid_spec=pltpu.PrefetchScalarGridSpec(
                num_scalar_prefetch=0,
                grid=grid,
                in_specs=[
                    pl.BlockSpec((B, HW), lambda i: (i, 0)),
                    # Grid-invariant operator: keep a single VMEM copy.
                    pl.BlockSpec((HW, ohw_pad), lambda i: (0, 0),
                                 pipeline_mode=pl.Buffered(1)),
                ],
                out_specs=pl.BlockSpec((B, ohw_pad), lambda i: (i, 0)),
            ),
            compiler_params=pltpu.CompilerParams(
                dimension_semantics=("parallel",),
                vmem_limit_bytes=vmem_budget,
            ),
            cost_estimate=cost,
        )(xf, Mt)
        if ohw_pad != OHW:
            out = out[:, :OHW]
        return out.reshape(N, C, out_h, out_w)

    # ---- separable fallback for large spatial maps (fused operator too big) ----
    ow_pad = _round_up(out_w, 128)
    Ph, PwT = _separable_operators(H, W, out_h, out_w, kh, kw, sh, sw,
                                   pad_h, pad_w, ow_pad, dtype_name)
    x3 = x.reshape(NC, H, W)
    per_plane = (HW + out_h * ow_pad) * itemsize
    B = max(1, min(16, (4 * 1024 * 1024) // max(1, 2 * per_plane)))
    B = min(B, NC)
    grid = (pl.cdiv(NC, B),)

    kernel = functools.partial(_separable_kernel, scale=scale, planes=B)
    out = pl.pallas_call(
        kernel,
        out_shape=jax.ShapeDtypeStruct((NC, out_h, ow_pad), x.dtype),
        grid_spec=pltpu.PrefetchScalarGridSpec(
            num_scalar_prefetch=0,
            grid=grid,
            in_specs=[
                pl.BlockSpec((B, H, W), lambda i: (i, 0, 0)),
                pl.BlockSpec((W, ow_pad), lambda i: (0, 0),
                             pipeline_mode=pl.Buffered(1)),
                pl.BlockSpec((out_h, H), lambda i: (0, 0),
                             pipeline_mode=pl.Buffered(1)),
            ],
            out_specs=pl.BlockSpec((B, out_h, ow_pad), lambda i: (i, 0, 0)),
        ),
        compiler_params=pltpu.CompilerParams(
            dimension_semantics=("parallel",),
            vmem_limit_bytes=vmem_budget,
        ),
    )(x3, PwT, Ph)
    if ow_pad != out_w:
        out = out[:, :, :out_w]
    return out.reshape(N, C, out_h, out_w)


class AvgPool2d:
    """Functional stand-in for the mmocr AvgPool2d plugin (NCHW in/out)."""

    def __init__(self, kernel_size, stride=None, padding=0, **kwargs):
        self.kernel_size, self.stride, self.padding = kernel_size, stride, padding

    def __call__(self, x):
        return avg_pool2d(x, self.kernel_size, self.stride, self.padding)


# --------------------------------------------------------------------------
# pure-JAX reference (same nn.AvgPool2d semantics) + demo
# --------------------------------------------------------------------------
def _avg_pool2d_ref(x, kernel_size, stride=None, padding=0):
    kh, kw = _pair(kernel_size)
    sh, sw = _pair(kernel_size if stride is None else stride)
    pad_h, pad_w = _pair(padding)
    xp = jnp.pad(x, ((0, 0), (0, 0), (pad_h, pad_h), (pad_w, pad_w)))
    summed = jax.lax.reduce_window(
        xp, 0.0, jax.lax.add,
        window_dimensions=(1, 1, kh, kw),
        window_strides=(1, 1, sh, sw),
        padding="VALID")
    return summed / float(kh * kw)


if __name__ == "__main__":
    key = jax.random.PRNGKey(0)
    k1, k2 = jax.random.split(key)

    # Plugin-scale NCHW feature map -> fused single-matmul path.
    x = jax.random.normal(k1, (2, 4, 16, 16), dtype=jnp.float32)

    # kernel_size=3, stride=2, padding=1  ->  (2, 4, 8, 8)
    pool = AvgPool2d(kernel_size=3, stride=2, padding=1)
    out = jax.block_until_ready(pool(x))
    ref = _avg_pool2d_ref(x, kernel_size=3, stride=2, padding=1)
    assert out.shape == (2, 4, 8, 8), out.shape
    assert jnp.allclose(out, ref, atol=1e-4, rtol=1e-4)

    # Default-stride path (stride=None -> stride=kernel_size), no padding.
    out2 = jax.block_until_ready(avg_pool2d(x, kernel_size=2))
    ref2 = _avg_pool2d_ref(x, kernel_size=2)
    assert out2.shape == (2, 4, 8, 8), out2.shape
    assert jnp.allclose(out2, ref2, atol=1e-4, rtol=1e-4)

    # Larger spatial map -> fused operator would exceed the VMEM threshold,
    # exercises the separable two-matmul fallback.
    x3 = jax.random.normal(k2, (2, 4, 64, 64), dtype=jnp.float32)
    out3 = jax.block_until_ready(avg_pool2d(x3, kernel_size=3, stride=1, padding=1))
    ref3 = _avg_pool2d_ref(x3, kernel_size=3, stride=1, padding=1)
    assert out3.shape == (2, 4, 64, 64), out3.shape
    assert jnp.allclose(out3, ref3, atol=1e-4, rtol=1e-4)

    print("KERNEL_OK")
</pallas_src>

<mosaic_0001>
module attributes {stable_mosaic.version = 11 : i64} {
  func.func @_fused_kernel(%arg0: i32, %arg1: memref<8x256xf32, #tpu.memory_space<vmem>>, %arg2: memref<256x128xf32, #tpu.memory_space<vmem>>, %arg3: memref<8x128xf32, #tpu.memory_space<vmem>>) attributes {dimension_semantics = [#tpu.dimension_semantics<parallel>], iteration_bounds = array<i64: 1>, scalar_prefetch = 0 : i64, scratch_operands = 0 : i64, tpu.core_type = #tpu.core_type<tc>, window_params = [{transform_indices = @transform_0, window_bounds = array<i64: 8, 256>}, {pipeline_mode = #tpu.pipeline_mode<synchronous>, transform_indices = @transform_1, window_bounds = array<i64: 256, 128>}, {transform_indices = @transform_2, window_bounds = array<i64: 8, 128>}]} {
    %c0 = arith.constant 0 : index
    %c0_0 = arith.constant 0 : index
    %0 = vector.load %arg1[%c0, %c0_0] : memref<8x256xf32, #tpu.memory_space<vmem>>, vector<8x256xf32>
    %c0_1 = arith.constant 0 : index
    %c0_2 = arith.constant 0 : index
    %1 = vector.load %arg2[%c0_1, %c0_2] : memref<256x128xf32, #tpu.memory_space<vmem>>, vector<256x128xf32>
    %cst = arith.constant dense<0.000000e+00> : vector<8x128xf32>
    %2 = tpu.matmul %0, %1, %cst {dimension_numbers = #tpu.dot_dimension_numbers<[1], [0], [0], [1], [0, 0, 1, 1], [], []>} : vector<8x256xf32>, vector<256x128xf32>, vector<8x128xf32> -> vector<8x128xf32>
    %cst_3 = arith.constant 0.111111112 : f32
    %3 = vector.broadcast %cst_3 : f32 to vector<8x128xf32>
    %4 = arith.mulf %2, %3 : vector<8x128xf32>
    %c0_4 = arith.constant 0 : index
    %c0_5 = arith.constant 0 : index
    %5 = vector.load %arg3[%c0_4, %c0_5] : memref<8x128xf32, #tpu.memory_space<vmem>>, vector<8x128xf32>
    tpu.vector_store %arg3[%c0_4, %c0_5], %4 {strides = array<i32>} : memref<8x128xf32, #tpu.memory_space<vmem>>, vector<8x128xf32>,
    return
  }
  func.func @transform_0(%arg0: i32) -> (i32, i32) {
    %c0_i32 = arith.constant 0 : i32
    %c0_i32_0 = arith.constant 0 : i32
    return %arg0, %c0_i32 : i32, i32
  }
  func.func @transform_1(%arg0: i32) -> (i32, i32) {
    %c0_i32 = arith.constant 0 : i32
    %c0_i32_0 = arith.constant 0 : i32
    %c0_i32_1 = arith.constant 0 : i32
    return %c0_i32, %c0_i32_0 : i32, i32
  }
  func.func @transform_2(%arg0: i32) -> (i32, i32) {
    %c0_i32 = arith.constant 0 : i32
    %c0_i32_0 = arith.constant 0 : i32
    return %arg0, %c0_i32 : i32, i32
  }
}

</mosaic_0001>

<bundles_post_ra>
// kernel: tpu_custom_call.1
= control target key start
LH: loop header
LB: loop body
LE: loop exit
PB: predicated region body
PF: predicated region fallthrough
CT: control target
= control target key end

     0   :  { %7 = vsyncpa [#allocation3], 0  ;;  %s295_s0 = inlined_call_operand.hbm [shape: f32[8,256], index: 0, kind: input, shape index: {}]   ;;  %s296_s1 = inlined_call_operand.hbm [shape: f32[256,128], index: 1, kind: input, shape index: {}]   ;;  %s297_s2 = inlined_call_operand.hbm [shape: f32[8,128], index: 2, kind: output, shape index: {}]  }
   0x1   :  { %8 = vsyncpa [#allocation6], 0 }
   0x2   :  { %9 = vsyncpa [#allocation4], 0  ;;  %s266_s9 = smov [#allocation2]   ;;  %s267_s11 = smov [#allocation5]  }
   0x3   :  { %s16_s10 = sshll.u32 %s266_s9, 4  ;;  %s25_s12 = sshll.u32 %s267_s11, 4  ;;  %s17_s10 = int_to_ptr.vmem [resolvable:$true] %s16_s10  ;;  %s26_s12 = int_to_ptr.vmem [resolvable:$true] %s25_s12 }
   0x4   :  { %s208_s13 = scalar_lea.vmem %s17_s10, 256  ;;  %p213_p1 = scmp.lt.s32.totalorder %s17_s10, %s17_s10 }
   0x5   :  { %p209_p0 = scmp.ne.s32.totalorder %s17_s10, %s208_s13  ;;  %p214_p2 = scmp.lt.s32.totalorder %s208_s13, %s208_s13 }
   0x7   :  { %p215_p3 = por %p214_p2, %p213_p1 }
   0x9   :  { %p216_p4 = pnand %p215_p3, %p209_p0 }
   0xb   :  { %219 = shalt.err (!%p216_p4)
}
   0xc   :  { %19 = dma.hbm_to_vmem [thread:$0]  %s295_s0, 256, %s17_s10, [#allocation3]  }
   0xd   :  { %s228_s16 = scalar_lea.vmem %s26_s12, 4096  ;;  %p233_p6 = scmp.lt.s32.totalorder %s26_s12, %s26_s12 }
   0xe   :  { %p229_p5 = scmp.ne.s32.totalorder %s26_s12, %s228_s16  ;;  %p234_p7 = scmp.lt.s32.totalorder %s228_s16, %s228_s16 }
  0x10   :  { %p235_p8 = por %p234_p7, %p233_p6 }
  0x12   :  { %p236_p9 = pnand %p235_p8, %p229_p5 }
  0x14   :  { %239 = shalt.err (!%p236_p9)
}
  0x15   :  { %s268_s17 = smov 128   ;;  %s269_s18 = smov 8  }
  0x16   :  { %31 = dma.hbm_to_vmem [thread:$0]  %s296_s1, 4096, %s26_s12, [#allocation6], %s268_s17, %s268_s17, %s269_s18  }
  0x17   :  { %260 = dma.done.wait [#allocation3], 256  }
  0x18   :  { %261 = vsyncadd [#allocation3], 4294967040 }
  0x19   :  { %262 = dma.done.wait [#allocation6], 4096  }
  0x1a   :  { %263 = vsyncadd [#allocation6], 4294963200  ;;  %v71_v0 = vld [vmem:[#allocation5 + $0xf8] sm:$0xff]  ;;  %v70_v2 = vld [vmem:[#allocation5 + $0xf0] sm:$0xff]  ;;  %s270_s0 = smov [#allocation7]  }
  0x1b   :  { %v55_v1 = vld [vmem:[#allocation5 + $0x78] sm:$0xff]  ;;  %160 = vmatprep.subr.mxu0 %v71_v0  ;;  %v54_v3 = vld [vmem:[#allocation5 + $0x70] sm:$0xff]  ;;  %v69_v4 = vld [vmem:[#allocation5 + $0xe8] sm:$0xff]  ;;  %s150_s1 = sshll.u32 %s270_s0, 4  ;;  %s151_s1 = int_to_ptr.vmem [resolvable:$true] %s150_s1 }
  0x1c   :  { %161 = vmatpush3.msra.mxu0 %v55_v1  ;;  %v53_v5 = vld [vmem:[#allocation5 + $0x68] sm:$0xff]  ;;  %v68_v6 = vld [vmem:[#allocation5 + $0xe0] sm:$0xff]  ;;  %v67_v8 = vld [vmem:[#allocation5 + $0xd8] sm:$0xff]  ;;  %s240_s21 = scalar_lea.vmem %s151_s1, 128  ;;  %p245_p11 = scmp.lt.s32.totalorder %s151_s1, %s151_s1 }
  0x1d   :  { %162 = vmatprep.subr.mxu0 %v70_v2  ;;  %v52_v7 = vld [vmem:[#allocation5 + $0x60] sm:$0xff]  ;;  %v51_v9 = vld [vmem:[#allocation5 + $0x58] sm:$0xff]  ;;  %v66_v10 = vld [vmem:[#allocation5 + $0xd0] sm:$0xff]  ;;  %p241_p10 = scmp.ne.s32.totalorder %s151_s1, %s240_s21  ;;  %p246_p12 = scmp.lt.s32.totalorder %s240_s21, %s240_s21 }
  0x1e   :  { %163 = vmatpush3.msra.mxu0 %v54_v3  ;;  %v50_v11 = vld [vmem:[#allocation5 + $0x50] sm:$0xff]  ;;  %v65_v12 = vld [vmem:[#allocation5 + $0xc8] sm:$0xff]  ;;  %v39_v13 = vld [vmem:[#allocation2 + $0x8] sm:$0xff] }
  0x1f   :  { %164 = vmatprep.subr.mxu0 %v69_v4  ;;  %v49_v14 = vld [vmem:[#allocation5 + $0x48] sm:$0xff]  ;;  %136 = vmatprep.mubr.f32.mxu0 %v39_v13  ;;  %v64_v15 = vld [vmem:[#allocation5 + $0xc0] sm:$0xff]  ;;  %v63_v17 = vld [vmem:[#allocation5 + $0xb8] sm:$0xff]  ;;  %p247_p13 = por %p246_p12, %p245_p11 }
  0x20   :  { %165 = vmatpush3.msra.mxu0 %v53_v5  ;;  %v48_v16 = vld [vmem:[#allocation5 + $0x40] sm:$0xff]  ;;  %v47_v18 = vld [vmem:[#allocation5 + $0x38] sm:$0xff]  ;;  %v62_v19 = vld [vmem:[#allocation5 + $0xb0] sm:$0xff] }
  0x21   :  { %166 = vmatprep.subr.mxu0 %v68_v6  ;;  %v46_v20 = vld [vmem:[#allocation5 + $0x30] sm:$0xff]  ;;  %v61_v21 = vld [vmem:[#allocation5 + $0xa8] sm:$0xff]  ;;  %v60_v23 = vld [vmem:[#allocation5 + $0xa0] sm:$0xff]  ;;  %p248_p0 = pnand %p247_p13, %p241_p10 }
  0x22   :  { %167 = vmatpush3.msra.mxu0 %v52_v7  ;;  %v45_v22 = vld [vmem:[#allocation5 + $0x28] sm:$0xff]  ;;  %v44_v24 = vld [vmem:[#allocation5 + $0x20] sm:$0xff]  ;;  %v59_v25 = vld [vmem:[#allocation5 + $0x98] sm:$0xff] }
  0x23   :  { %168 = vmatprep.subr.mxu0 %v67_v8  ;;  %v43_v26 = vld [vmem:[#allocation5 + $0x18] sm:$0xff]  ;;  %v58_v27 = vld [vmem:[#allocation5 + $0x90] sm:$0xff]  ;;  %v57_v29 = vld [vmem:[#allocation5 + $0x88] sm:$0xff] }
  0x24   :  { %169 = vmatpush3.msra.mxu0 %v51_v9  ;;  %v42_v28 = vld [vmem:[#allocation5 + $0x10] sm:$0xff]  ;;  %v41_v30 = vld [vmem:[#allocation5 + $0x8] sm:$0xff]  ;;  %v56_v31 = vld [vmem:[#allocation5 + $0x80] sm:$0xff] }
  0x25   :  { %170 = vmatprep.subr.mxu0 %v66_v10  ;;  %v40_v32 = vld [vmem:[#allocation5] sm:$0xff]  ;;  %v38_v33 = vld [vmem:[#allocation2] sm:$0xff] }
  0x26   :  { %171 = vmatpush3.msra.mxu0 %v50_v11 }
  0x27   :  { %172 = vmatprep.subr.mxu0 %v65_v12 }
  0x28   :  { %173 = vmatpush3.msra.mxu0 %v49_v14 }
  0x29   :  { %174 = vmatprep.subr.mxu0 %v64_v15 }
  0x2a   :  { %175 = vmatpush3.msra.mxu0 %v48_v16 }
  0x2b   :  { %176 = vmatprep.subr.mxu0 %v63_v17 }
  0x2c   :  { %177 = vmatpush3.msra.mxu0 %v47_v18 }
  0x2d   :  { %178 = vmatprep.subr.mxu0 %v62_v19 }
  0x2e   :  { %179 = vmatpush3.msra.mxu0 %v46_v20 }
  0x2f   :  { %180 = vmatprep.subr.mxu0 %v61_v21 }
  0x30   :  { %181 = vmatpush3.msra.mxu0 %v45_v22 }
  0x31   :  { %182 = vmatprep.subr.mxu0 %v60_v23 }
  0x32   :  { %183 = vmatpush3.msra.mxu0 %v44_v24 }
  0x33   :  { %184 = vmatprep.subr.mxu0 %v59_v25 }
  0x34   :  { %185 = vmatpush3.msra.mxu0 %v43_v26 }
  0x35   :  { %186 = vmatprep.subr.mxu0 %v58_v27 }
  0x36   :  { %187 = vmatpush3.msra.mxu0 %v42_v28 }
  0x37   :  { %188 = vmatprep.subr.mxu0 %v57_v29 }
  0x38   :  { %189 = vmatpush3.msra.mxu0 %v41_v30 }
  0x39   :  { %190 = vmatprep.subr.mxu0 %v56_v31 }
  0x3a   :  { %191 = vmatpush3.msra.mxu0 %v40_v32 }
  0x3b   :  { %137 = vmatmul.mubr.f32.vlgmr.msra.gmra.mxu0 %v38_v33 }
  0xfb   :  { %v192_v34 = vpop.f32.mrf.mxu0 }
  0xfd   :  { %v193_v35 = vpop.f32.mrf.mxu0 }
  0xfe   :  { %v194_v36 = vadd.f32 %v193_v35, %v192_v34 }
 0x100   :  { %v142_v37 = vmul.f32 0.11111111, %v194_v36 }
 0x102   :  { %143 = vst [vmem:[#allocation7] sm:$0xff] %v142_v37 }
 0x103   :  { %251 = shalt.err (!%p248_p0)
}
 0x104   :  { %153 = dma.vmem_to_hbm [thread:$0]  %s151_s1, 128, %s297_s2, [#allocation4]  }
 0x105   :  { %264 = dma.done.wait [#allocation4], 128  }
 0x106   :  { %265 = vsyncadd [#allocation4], 4294967168 }
 0x107   :  { %157 = vsyncpa [#allocation3], 1 }
 0x108   :  { %158 = vsyncpa [#allocation6], 1 }
 0x109   :  { %159 = vsyncpa [#allocation4], 1 }

</bundles_post_ra>
